<compile_context>
chip_gen: v7x
topology: tpu7x:2x2x1
jax: 0.10.0
libtpu: 0.0.40
codegen_flags: <defaults>
</compile_context>

<pallas_src>
import jax
import jax.numpy as jnp
import numpy as np
from jax.experimental import pallas as pl
from jax.experimental.pallas import tpu as pltpu


def _round_up(x, m):
    return ((x + m - 1) // m) * m


def _cdiv(a, b):
    return (a + b - 1) // b


def _mix_kernel(x_ref, xcopy_ref, lam_ref, o_ref):
    """Elementwise mix over one (TR, TN) tile.

    x_ref, xcopy_ref, o_ref : VMEM (TR, TN)
    lam_ref                 : VMEM (TR, 1)  -- per-row lambda, broadcast over lanes
    """
    lam = lam_ref[...].astype(x_ref.dtype)        # (TR, 1)
    xv = x_ref[...]                               # (TR, TN)
    xc = xcopy_ref[...]                           # (TR, TN)
    # lam*x + (1-lam)*xc  ==  xc + lam*(x - xc)   (one fewer broadcast multiply)
    o_ref[...] = (xc + lam * (xv - xc)).astype(o_ref.dtype)


def _pick_tiles(R, N):
    """Pick (TR, TN): big (~2 MiB f32) lane-dense blocks, (8,128)-legal."""
    TN = min(_round_up(N, 128), 2048)     # lane tile, multiple of 128
    TR = min(_round_up(R, 8), 256)        # sublane/row tile, multiple of 8
    # Guarantee >= 2 grid steps along one "parallel" axis for small inputs so
    # v7x megacore can split the work across its two TensorCores.
    if _cdiv(R, TR) == 1 and _cdiv(N, TN) == 1:
        if N > 128:
            TN = max(128, _round_up(_cdiv(N, 2), 128))
        elif R > 8:
            TR = max(8, _round_up(_cdiv(R, 2), 8))
    return TR, TN


@jax.jit
def efdmix_forward(x, lmda, perm):
    """EFDMix mixing path.

    Args:
      x:    (B, C, H, W) float32, NCHW.
      lmda: (B,) float32, Beta(alpha, alpha) samples.
      perm: (B,) int32, permutation of batch indices.
    Returns:
      (B, C, H, W) float32.
    """
    B, C, H, W = x.shape
    N = H * W
    R = B * C
    xv = x.reshape(B, C, N)

    # ---- JAX glue: sorting has no clean Pallas TPU equivalent. --------------
    # One key-value sort gives value_x and index_x in a single pass ...
    pos = jax.lax.broadcasted_iota(jnp.int32, (B, C, N), 2)
    value_x, index_x = jax.lax.sort((xv, pos), dimension=-1, num_keys=1)
    vperm = value_x[perm]                                   # (B, C, N)
    # ... and a second key-value sort keyed on index_x scatters the permuted
    # sorted values back to original positions:
    #   x_copy[..., index_x[k]] = vperm[..., k]
    # which equals vperm[..., rank(x)] -- no argsort(index_x) needed.
    _, x_copy = jax.lax.sort((index_x, vperm), dimension=-1, num_keys=1)

    # ---- Layout for the Pallas mix: lane-dense (B*C, N) 2-D view. -----------
    x2 = xv.reshape(R, N)
    xc2 = x_copy.reshape(R, N)
    lam_rows = jnp.repeat(lmda.astype(jnp.float32), C).reshape(R, 1)

    TR, TN = _pick_tiles(R, N)
    grid = (_cdiv(R, TR), _cdiv(N, TN))       # ragged edges: no pad / no slice

    tile = pl.BlockSpec((TR, TN), lambda i, j: (i, j))
    lam_spec = pl.BlockSpec((TR, 1), lambda i, j: (i, 0))

    itemsize = jnp.dtype(x.dtype).itemsize
    cost = pl.CostEstimate(
        flops=2 * R * N,
        transcendentals=0,
        bytes_accessed=3 * R * N * itemsize,
    )

    out = pl.pallas_call(
        _mix_kernel,
        out_shape=jax.ShapeDtypeStruct((R, N), x.dtype),
        grid_spec=pltpu.PrefetchScalarGridSpec(
            num_scalar_prefetch=0,
            grid=grid,
            in_specs=[tile, tile, lam_spec],
            out_specs=tile,
        ),
        compiler_params=pltpu.CompilerParams(
            dimension_semantics=("parallel", "parallel"),
            vmem_limit_bytes=32 * 1024 * 1024,
        ),
        cost_estimate=cost,
        input_output_aliases={0: 0},   # write the mix in place over x2
    )(x2, xc2, lam_rows)

    return out.reshape(B, C, H, W)


def efdmix_reference(x, lmda, perm):
    """Pure-JAX reference mirroring the PyTorch forward (independent path)."""
    B, C, H, W = x.shape
    xv = x.reshape(B, C, H * W)
    value_x = jnp.sort(xv, axis=-1)
    index_x = jnp.argsort(xv, axis=-1)
    inverse_index = jnp.argsort(index_x, axis=-1)
    lam = lmda.reshape(B, 1, 1)
    x_copy = jnp.take_along_axis(value_x[perm], inverse_index, axis=-1) * (1.0 - lam)
    new_x = xv + (x_copy - xv * (1.0 - lam))
    return new_x.reshape(B, C, H, W)


if __name__ == "__main__":
    # EFDMix(p=0.5, alpha=0.1): the host-side `random.random() > p` gate and
    # the training-mode / activation early returns are control flow handled by
    # the caller; here we always run the mixing path deterministically.
    # TODO(synk): the custom backward (Replace_with_grad / detach semantics) is
    # not part of the forward pass and is not implemented here.
    alpha = 0.1
    B, C, H, W = 2, 4, 16, 16

    key = jax.random.PRNGKey(0)
    kx, klam, kperm = jax.random.split(key, 3)

    x = jax.random.normal(kx, (B, C, H, W), dtype=jnp.float32)
    lmda = jax.random.beta(klam, alpha, alpha, shape=(B,)).astype(jnp.float32)
    perm = jax.random.permutation(kperm, B).astype(jnp.int32)

    out = efdmix_forward(x, lmda, perm)
    out = jax.block_until_ready(out)

    ref = jax.block_until_ready(efdmix_reference(x, lmda, perm))
    np.testing.assert_allclose(np.asarray(out), np.asarray(ref), rtol=1e-5, atol=1e-5)

    print("KERNEL_OK")
</pallas_src>

<mosaic_0001>
module attributes {stable_mosaic.version = 11 : i64} {
  func.func @_mix_kernel(%arg0: i32, %arg1: i32, %arg2: memref<8x128xf32, #tpu.memory_space<vmem>>, %arg3: memref<8x128xf32, #tpu.memory_space<vmem>>, %arg4: memref<8x1xf32, #tpu.memory_space<vmem>>, %arg5: memref<8x128xf32, #tpu.memory_space<vmem>>) attributes {dimension_semantics = [#tpu.dimension_semantics<parallel>, #tpu.dimension_semantics<parallel>], iteration_bounds = array<i64: 1, 2>, scalar_prefetch = 0 : i64, scratch_operands = 0 : i64, tpu.core_type = #tpu.core_type<tc>, window_params = [{transform_indices = @transform_0, window_bounds = array<i64: 8, 128>}, {transform_indices = @transform_1, window_bounds = array<i64: 8, 128>}, {transform_indices = @transform_2, window_bounds = array<i64: 8, 1>}, {transform_indices = @transform_3, window_bounds = array<i64: 8, 128>}]} {
    %c0 = arith.constant 0 : index
    %c0_0 = arith.constant 0 : index
    %0 = vector.load %arg4[%c0, %c0_0] : memref<8x1xf32, #tpu.memory_space<vmem>>, vector<8x1xf32>
    %c0_1 = arith.constant 0 : index
    %c0_2 = arith.constant 0 : index
    %1 = vector.load %arg2[%c0_1, %c0_2] : memref<8x128xf32, #tpu.memory_space<vmem>>, vector<8x128xf32>
    %c0_3 = arith.constant 0 : index
    %c0_4 = arith.constant 0 : index
    %2 = vector.load %arg3[%c0_3, %c0_4] : memref<8x128xf32, #tpu.memory_space<vmem>>, vector<8x128xf32>
    %3 = arith.subf %1, %2 : vector<8x128xf32>
    %4 = vector.broadcast %0 : vector<8x1xf32> to vector<8x128xf32>
    %5 = arith.mulf %4, %3 : vector<8x128xf32>
    %6 = arith.addf %2, %5 : vector<8x128xf32>
    %c0_5 = arith.constant 0 : index
    %c0_6 = arith.constant 0 : index
    %7 = vector.load %arg5[%c0_5, %c0_6] : memref<8x128xf32, #tpu.memory_space<vmem>>, vector<8x128xf32>
    tpu.vector_store %arg5[%c0_5, %c0_6], %6 {strides = array<i32>} : memref<8x128xf32, #tpu.memory_space<vmem>>, vector<8x128xf32>,
    return
  }
  func.func @transform_0(%arg0: i32, %arg1: i32) -> (i32, i32) {
    %c0_i32 = arith.constant 0 : i32
    return %arg0, %arg1 : i32, i32
  }
  func.func @transform_1(%arg0: i32, %arg1: i32) -> (i32, i32) {
    %c0_i32 = arith.constant 0 : i32
    return %arg0, %arg1 : i32, i32
  }
  func.func @transform_2(%arg0: i32, %arg1: i32) -> (i32, i32) {
    %c0_i32 = arith.constant 0 : i32
    %c0_i32_0 = arith.constant 0 : i32
    return %arg0, %c0_i32 : i32, i32
  }
  func.func @transform_3(%arg0: i32, %arg1: i32) -> (i32, i32) {
    %c0_i32 = arith.constant 0 : i32
    return %arg0, %arg1 : i32, i32
  }
}

</mosaic_0001>

<bundles_post_ra>
// kernel: efdmix_forward.1
= control target key start
LH: loop header
LB: loop body
LE: loop exit
PB: predicated region body
PF: predicated region fallthrough
CT: control target
= control target key end

     0   :  { %s461_s12 = smov 0   ;;  %s463_s13 = smov 0   ;;  %s493_s0 = inlined_call_operand.vmem [shape: f32[8,256], index: 0, kind: input, shape index: {}, may-alias: {0,3}]   ;;  %s494_s1 = inlined_call_operand.vmem [shape: f32[8,256], index: 1, kind: input, shape index: {}]   ;;  %s495_s2 = inlined_call_operand.vmem [shape: f32[8,1], index: 2, kind: input, shape index: {}]   ;;  %s496_s3 = inlined_call_operand.vmem [shape: f32[8,256], index: 3, kind: output, shape index: {}, may-alias: {0,3}]  }
   0x1   :  { %s465_s14 = smov 0  }
   0x2 LB: > { %s22_s15 = sadd.s32 1, %s434_s13  ;;  %p384_p0 = scmp.ge.s32.totalorder %s438_s14, 1  ;;  %s438_s14 = sphi %s465_s14, %s13_s14   ;;  %s434_s13 = sphi %s463_s13, %s498_s13   ;;  %s430_s12 = sphi %s461_s12, %s497_s12  }
   0x3   : > { %p23_p1 = scmp.ge.s32.totalorder %s22_s15, 2  ;;  %p180_p2 = scmp.lt.s32.totalorder %s438_s14, 3 }
   0x5   : > { %s500_s15 = smov (%p23_p1, %s22_s15), 0  ;;  %p181_p3 = pnand %p384_p0, %p180_p2 }
   0x6   : > { %v250_v0 = vld [vmem:[%s495_s2] sm:$0xff] (!%p181_p3)  ;;  %v440_v1 = vmov (!%p181_p3), 0   ;;  %p224_p4 = scmp.lt.s32.totalorder (!%p181_p3), %s430_s12, 1 }
   0x7   : > { %184 = sbr.rel (%p181_p3) target bundleno = 141 (0x8d), region = 32  ;;  %415 = vset.pattern.permute.xlu0 (!%p181_p3), %v440_v1 }
   0x8   : > { %256 = vperm.xlu0 (!%p181_p3), %415, %v250_v0  }
   0xe   : > { %s502_s12 = smov (!%p224_p4, %s430_s12), 1 }
   0xf   : > { %s385_s18 = sshll.u32 %s502_s12, 3 }
  0x10   : > { %s229_s21 = scalar_lea.vmem %s493_s0, %s385_s18  ;;  %s237_s24 = scalar_lea.vmem %s494_s1, %s385_s18 }
  0x11   : > { %v251_v2 = vld [vmem:[%s229_s21] sm:$0xff]  ;;  %s249_s27 = scalar_lea.vmem %s496_s3, %s385_s18 }
  0x12   : > { %v252_v3 = vld [vmem:[%s237_s24] sm:$0xff] }
  0x13   : > { %v253_v4 = vsub.f32 %v251_v2, %v252_v3 }
  0x87   : > { %v257_v5 = vpop.permute.xlu0 %256 }
  0x88   : > { %v259_v6 = vmul.f32 %v257_v5, %v253_v4 }
  0x8a   : > { %v260_v7 = vadd.f32 %v259_v6, %v252_v3 }
  0x8c   : > { %261 = vst [vmem:[%s249_s27] sm:$0xff] %v260_v7 }
  0x8d PF: > { %s13_s14 = sadd.s32 1, %s438_s14   ;;  %s497_s12 = smov %s434_s13 }
  0x8e   : > { %p10_p5 = scmp.ge.s32.totalorder %s13_s14, 4   ;;  %s498_s13 = smov %s500_s15 }
  0x90   :  { %12 = sbr.rel (!%p10_p5) target bundleno = 2 (0x2), region = 68 }

</bundles_post_ra>
